<compile_context>
chip_gen: v7x
topology: tpu7x:2x2x1
jax: 0.10.0
libtpu: 0.0.40
codegen_flags: <defaults>
</compile_context>

<pallas_src>
import functools

import jax
import jax.numpy as jnp
from jax import lax
from jax.experimental import pallas as pl
from jax.experimental.pallas import tpu as pltpu

_LANES = 128


def _int_pow(x, e):
    """x ** e for a small positive integer e, as VPU multiplies only."""
    result = None
    base = x
    while e:
        if e & 1:
            result = base if result is None else result * base
        e >>= 1
        if e:
            base = base * base
    return result


def _pow(x, p):
    if p == 1:
        return x
    if p == 2:
        return x * x
    p_int = int(p)
    if float(p_int) == float(p) and 0 < p_int <= 16:
        return _int_pow(x, p_int)
    # Fractional p: exp/log chain on the EUP (accounted in CostEstimate).
    return x ** p


def _accumulate(p_ref, t_ref, num_acc, den_acc, *, valid_rows, sub, p, unroll):
    """Accumulate num/den terms over exactly `valid_rows` rows of the block.

    `valid_rows` is a static Python int, so no runtime masking is needed:
    full (sub, 128) chunks go through an unrolled fori_loop; a static tail of
    (valid_rows % sub) rows is read with a static partial slice.
    """

    def tile_terms(x_raw, y_raw):
        x = x_raw.astype(jnp.float32)
        y = y_raw.astype(jnp.float32)
        return x * y, _pow(x, p) + _pow(y, p)

    n_full = valid_rows // sub
    tail = valid_rows - n_full * sub

    if n_full > 0:
        def body(c, carry):
            start = pl.multiple_of(c * sub, sub)
            nt, dt = tile_terms(p_ref[0, pl.ds(start, sub), :],
                                t_ref[0, pl.ds(start, sub), :])
            num_acc[...] += nt
            den_acc[...] += dt
            return carry

        lax.fori_loop(0, n_full, body, 0, unroll=min(unroll, n_full))

    if tail > 0:
        lo = n_full * sub
        nt, dt = tile_terms(p_ref[0, lo:lo + tail, :],
                            t_ref[0, lo:lo + tail, :])
        num_acc[0:tail, :] += nt
        den_acc[0:tail, :] += dt


def _dice_kernel(p_ref, t_ref, out_ref, num_acc, den_acc, *,
                 smooth, p, rows, row_tile, sub, unroll):
    k = pl.program_id(1)
    nk = pl.num_programs(1)

    @pl.when(k == 0)
    def _():
        num_acc[...] = jnp.zeros_like(num_acc)
        den_acc[...] = jnp.zeros_like(den_acc)

    nk_static = -(-rows // row_tile)
    rem = rows - (nk_static - 1) * row_tile
    acc = functools.partial(_accumulate, p_ref, t_ref, num_acc, den_acc,
                            sub=sub, p=p, unroll=unroll)

    if rem == row_tile:
        # Every block is full: single, unmasked hot path.
        acc(valid_rows=row_tile)
    else:
        # Steady state stays unmasked; only the (single) last block runs the
        # statically-shortened variant.
        @pl.when(k != nk - 1)
        def _():
            acc(valid_rows=row_tile)

        @pl.when(k == nk - 1)
        def _():
            acc(valid_rows=rem)

    @pl.when(k == nk - 1)
    def _():
        # Single XLU reduce + scalar math, once per batch row.
        num = jnp.sum(num_acc[...]) + jnp.float32(smooth)
        den = jnp.sum(den_acc[...]) + jnp.float32(smooth)
        loss = 1.0 - num / den
        # Lane-dense broadcast store; the wrapper picks lane 0.
        out_ref[...] = jnp.broadcast_to(loss, out_ref.shape).astype(jnp.float32)


def binary_dice_loss(predict, target, smooth=1.0, p=2, reduction="mean",
                     vmem_budget_bytes=8 * 1024 * 1024, unroll=8):
    assert predict.shape[0] == target.shape[0], \
        "predict & target batch size don't match"
    assert p > 0, "p must be > 0 (zero padding is only reduction-neutral then)"

    n = predict.shape[0]
    x = predict.reshape(n, -1)
    y = target.reshape(n, -1)
    d = x.shape[1]

    # The lane axis must be 128-wide; pad only if D is not already a multiple
    # of 128 (no extra HBM pass in the common NCHW case).
    d_pad = pl.cdiv(d, _LANES) * _LANES
    if d_pad != d:
        # TODO(synk): lane-mask the ragged final 128-chunk in-kernel instead of
        # this extra HBM pad pass (only taken when D % 128 != 0).
        pad = [(0, 0), (0, d_pad - d)]
        x = jnp.pad(x, pad)
        y = jnp.pad(y, pad)
    rows = d_pad // _LANES

    x3 = x.reshape(n, rows, _LANES)
    y3 = y.reshape(n, rows, _LANES)

    itemsize = jnp.dtype(predict.dtype).itemsize
    # Sublane packing: 8 for 32-bit, 16 for bf16/f16, 32 for int8/fp8.
    sub = max(8, 32 // itemsize)
    bytes_per_row = _LANES * itemsize

    # VMEM-budget-driven row tile: 2 inputs x 2 pipeline buffers per step.
    r_max = vmem_budget_bytes // (4 * bytes_per_row)
    r_max = max(sub, (r_max // sub) * sub)
    if rows <= r_max:
        r = rows                      # single reduction step per batch row
    else:
        r = r_max
    nk = pl.cdiv(rows, r)

    kernel = functools.partial(_dice_kernel, smooth=float(smooth), p=p,
                               rows=rows, row_tile=r, sub=sub, unroll=unroll)

    p_is_int = float(int(p)) == float(p)
    cost = pl.CostEstimate(
        flops=6 * n * d,
        transcendentals=0 if p_is_int else 2 * n * d,
        bytes_accessed=2 * n * d * itemsize + n * 4,
    )

    compiler_kwargs = dict(dimension_semantics=("parallel", "arbitrary"))
    pipelined_bytes = 4 * r * bytes_per_row
    if pipelined_bytes > 12 * 1024 * 1024:
        # Keep headroom above v5e's 16 MiB scoped-VMEM default.
        compiler_kwargs["vmem_limit_bytes"] = int(pipelined_bytes * 2)

    out = pl.pallas_call(
        kernel,
        out_shape=jax.ShapeDtypeStruct((n, 1, _LANES), jnp.float32),
        grid_spec=pltpu.PrefetchScalarGridSpec(
            num_scalar_prefetch=0,
            grid=(n, nk),
            in_specs=[
                pl.BlockSpec((1, r, _LANES), lambda b, k: (b, k, 0)),
                pl.BlockSpec((1, r, _LANES), lambda b, k: (b, k, 0)),
            ],
            out_specs=pl.BlockSpec((1, 1, _LANES), lambda b, k: (b, 0, 0)),
            scratch_shapes=[
                pltpu.VMEM((sub, _LANES), jnp.float32),
                pltpu.VMEM((sub, _LANES), jnp.float32),
            ],
        ),
        compiler_params=pltpu.CompilerParams(**compiler_kwargs),
        cost_estimate=cost,
    )(x3, y3)

    loss = out[:, 0, 0]  # shape [N]

    if reduction == "mean":
        return jnp.mean(loss)
    elif reduction == "sum":
        return jnp.sum(loss)
    elif reduction == "none":
        return loss
    else:
        raise Exception("Unexpected reduction {}".format(reduction))


def _reference(predict, target, smooth=1.0, p=2, reduction="mean"):
    n = predict.shape[0]
    x = predict.reshape(n, -1).astype(jnp.float32)
    y = target.reshape(n, -1).astype(jnp.float32)
    num = jnp.sum(x * y, axis=1) + smooth
    den = jnp.sum(x ** p + y ** p, axis=1) + smooth
    loss = 1.0 - num / den
    if reduction == "mean":
        return jnp.mean(loss)
    elif reduction == "sum":
        return jnp.sum(loss)
    return loss


if __name__ == "__main__":
    key = jax.random.PRNGKey(0)
    k1, k2 = jax.random.split(key)

    # Case 1: standard NCHW probabilities vs. binary mask, 'mean', p=2.
    N, C, H, W = 2, 4, 16, 16                      # D = 1024 -> rows = 8
    predict = jax.nn.sigmoid(jax.random.normal(k1, (N, C, H, W), jnp.float32))
    target = (jax.random.uniform(k2, (N, C, H, W)) > 0.5).astype(jnp.float32)
    out = jax.block_until_ready(
        binary_dice_loss(predict, target, smooth=1.0, p=2, reduction="mean"))
    ref = _reference(predict, target, 1.0, 2, "mean")
    assert jnp.allclose(out, ref, atol=1e-5, rtol=1e-5), (out, ref)

    # Case 2: rows not a multiple of the sublane packing (static tail path),
    # p=1 fast path, 'none' reduction.
    N2, C2, H2, W2 = 2, 3, 24, 16                  # D = 1152 -> rows = 9
    p2 = jax.nn.sigmoid(jax.random.normal(k1, (N2, C2, H2, W2), jnp.float32))
    t2 = (jax.random.uniform(k2, (N2, C2, H2, W2)) > 0.5).astype(jnp.float32)
    out2 = jax.block_until_ready(binary_dice_loss(p2, t2, p=1, reduction="none"))
    ref2 = _reference(p2, t2, 1.0, 1, "none")
    assert jnp.allclose(out2, ref2, atol=1e-5, rtol=1e-5), (out2, ref2)

    # Case 3: rows > sub (exercises the unrolled chunk loop), 'sum', p=2.
    N3, C3, H3, W3 = 2, 8, 16, 16                  # D = 2048 -> rows = 16
    p3 = jax.nn.sigmoid(jax.random.normal(k1, (N3, C3, H3, W3), jnp.float32))
    t3 = (jax.random.uniform(k2, (N3, C3, H3, W3)) > 0.5).astype(jnp.float32)
    out3 = jax.block_until_ready(binary_dice_loss(p3, t3, reduction="sum"))
    ref3 = _reference(p3, t3, 1.0, 2, "sum")
    assert jnp.allclose(out3, ref3, atol=1e-5, rtol=1e-5), (out3, ref3)

    # Case 4: tiny VMEM budget forces a multi-step reduction with a partial
    # last row tile (exercises the pl.when-duplicated accumulate), integer p=3.
    out4 = jax.block_until_ready(
        binary_dice_loss(p2, t2, p=3, reduction="none",
                         vmem_budget_bytes=16 * 1024))
    ref4 = _reference(p2, t2, 1.0, 3, "none")
    assert jnp.allclose(out4, ref4, atol=1e-5, rtol=1e-5), (out4, ref4)

    # Case 5: bf16 inputs (16-sublane packing, halved HBM bytes), 'mean'.
    p5 = predict.astype(jnp.bfloat16)
    t5 = target.astype(jnp.bfloat16)
    out5 = jax.block_until_ready(binary_dice_loss(p5, t5, reduction="mean"))
    ref5 = _reference(p5, t5, 1.0, 2, "mean")
    assert jnp.allclose(out5, ref5, atol=1e-4, rtol=1e-4), (out5, ref5)

    print("KERNEL_OK")
</pallas_src>

<mosaic_0001>
module attributes {stable_mosaic.version = 11 : i64} {
  func.func @_dice_kernel(%arg0: i32, %arg1: i32, %arg2: memref<1x8x128xf32, #tpu.memory_space<vmem>>, %arg3: memref<1x8x128xf32, #tpu.memory_space<vmem>>, %arg4: memref<1x1x128xf32, #tpu.memory_space<vmem>>, %arg5: memref<8x128xf32, #tpu.memory_space<vmem>>, %arg6: memref<8x128xf32, #tpu.memory_space<vmem>>) attributes {dimension_semantics = [#tpu.dimension_semantics<parallel>, #tpu.dimension_semantics<arbitrary>], iteration_bounds = array<i64: 2, 1>, scalar_prefetch = 0 : i64, scratch_operands = 2 : i64, tpu.core_type = #tpu.core_type<tc>, window_params = [{transform_indices = @transform_0, window_bounds = array<i64: 1, 8, 128>}, {transform_indices = @transform_1, window_bounds = array<i64: 1, 8, 128>}, {transform_indices = @transform_2, window_bounds = array<i64: 1, 1, 128>}]} {
    %c0_i32 = arith.constant 0 : i32
    %0 = arith.cmpi eq, %arg1, %c0_i32 : i32
    %1 = arith.extui %0 : i1 to i32
    %c0_i32_0 = arith.constant 0 : i32
    %2 = arith.cmpi ne, %1, %c0_i32_0 : i32
    scf.if %2 {
      %cst = arith.constant 0.000000e+00 : f32
      %24 = vector.broadcast %cst : f32 to vector<8x128xf32>
      %c0_15 = arith.constant 0 : index
      %c0_16 = arith.constant 0 : index
      %25 = vector.load %arg5[%c0_15, %c0_16] : memref<8x128xf32, #tpu.memory_space<vmem>>, vector<8x128xf32>
      tpu.vector_store %arg5[%c0_15, %c0_16], %24 {strides = array<i32>} : memref<8x128xf32, #tpu.memory_space<vmem>>, vector<8x128xf32>,
      %cst_17 = arith.constant 0.000000e+00 : f32
      %26 = vector.broadcast %cst_17 : f32 to vector<8x128xf32>
      %c0_18 = arith.constant 0 : index
      %c0_19 = arith.constant 0 : index
      %27 = vector.load %arg6[%c0_18, %c0_19] : memref<8x128xf32, #tpu.memory_space<vmem>>, vector<8x128xf32>
      tpu.vector_store %arg6[%c0_18, %c0_19], %26 {strides = array<i32>} : memref<8x128xf32, #tpu.memory_space<vmem>>, vector<8x128xf32>,
    } else {
    }
    %c0_i32_1 = arith.constant 0 : i32
    %c8_i32 = arith.constant 8 : i32
    %3 = arith.muli %c0_i32_1, %c8_i32 : i32
    %4 = tpu.assume_multiple %3, 8 : i32
    %c0 = arith.constant 0 : index
    %5 = arith.index_cast %4 : i32 to index
    %c0_2 = arith.constant 0 : index
    %6 = vector.load %arg2[%c0, %5, %c0_2] : memref<1x8x128xf32, #tpu.memory_space<vmem>>, vector<1x8x128xf32>
    %7 = vector.shape_cast %6 : vector<1x8x128xf32> to vector<8x128xf32>
    %c0_3 = arith.constant 0 : index
    %8 = arith.index_cast %4 : i32 to index
    %c0_4 = arith.constant 0 : index
    %9 = vector.load %arg3[%c0_3, %8, %c0_4] : memref<1x8x128xf32, #tpu.memory_space<vmem>>, vector<1x8x128xf32>
    %10 = vector.shape_cast %9 : vector<1x8x128xf32> to vector<8x128xf32>
    %11 = arith.mulf %7, %10 : vector<8x128xf32>
    %12 = arith.mulf %7, %7 : vector<8x128xf32>
    %13 = arith.mulf %10, %10 : vector<8x128xf32>
    %14 = arith.addf %12, %13 : vector<8x128xf32>
    %c0_5 = arith.constant 0 : index
    %c0_6 = arith.constant 0 : index
    %15 = vector.load %arg5[%c0_5, %c0_6] : memref<8x128xf32, #tpu.memory_space<vmem>>, vector<8x128xf32>
    %16 = arith.addf %15, %11 : vector<8x128xf32>
    %c0_7 = arith.constant 0 : index
    %c0_8 = arith.constant 0 : index
    %17 = vector.load %arg5[%c0_7, %c0_8] : memref<8x128xf32, #tpu.memory_space<vmem>>, vector<8x128xf32>
    tpu.vector_store %arg5[%c0_7, %c0_8], %16 {strides = array<i32>} : memref<8x128xf32, #tpu.memory_space<vmem>>, vector<8x128xf32>,
    %c0_9 = arith.constant 0 : index
    %c0_10 = arith.constant 0 : index
    %18 = vector.load %arg6[%c0_9, %c0_10] : memref<8x128xf32, #tpu.memory_space<vmem>>, vector<8x128xf32>
    %19 = arith.addf %18, %14 : vector<8x128xf32>
    %c0_11 = arith.constant 0 : index
    %c0_12 = arith.constant 0 : index
    %20 = vector.load %arg6[%c0_11, %c0_12] : memref<8x128xf32, #tpu.memory_space<vmem>>, vector<8x128xf32>
    tpu.vector_store %arg6[%c0_11, %c0_12], %19 {strides = array<i32>} : memref<8x128xf32, #tpu.memory_space<vmem>>, vector<8x128xf32>,
    %c1_i32 = arith.constant 1 : i32
    %c0_i32_13 = arith.constant 0 : i32
    %21 = arith.cmpi eq, %arg1, %c0_i32_13 : i32
    %22 = arith.extui %21 : i1 to i32
    %c0_i32_14 = arith.constant 0 : i32
    %23 = arith.cmpi ne, %22, %c0_i32_14 : i32
    scf.if %23 {
      %c0_15 = arith.constant 0 : index
      %c0_16 = arith.constant 0 : index
      %24 = vector.load %arg5[%c0_15, %c0_16] : memref<8x128xf32, #tpu.memory_space<vmem>>, vector<8x128xf32>
      %25 = vector.shape_cast %24 : vector<8x128xf32> to vector<1x8x128xf32>
      %cst = arith.constant dense<0.000000e+00> : vector<1xf32>
      %26 = vector.multi_reduction <add>, %25, %cst [1, 2] : vector<1x8x128xf32> to vector<1xf32>
      %27 = vector.shape_cast %26 : vector<1xf32> to vector<1x1x1xf32>
      %28 = vector.extract %27[0, 0, 0] : f32 from vector<1x1x1xf32>
      %cst_17 = arith.constant 1.000000e+00 : f32
      %29 = arith.addf %28, %cst_17 : f32
      %c0_18 = arith.constant 0 : index
      %c0_19 = arith.constant 0 : index
      %30 = vector.load %arg6[%c0_18, %c0_19] : memref<8x128xf32, #tpu.memory_space<vmem>>, vector<8x128xf32>
      %31 = vector.shape_cast %30 : vector<8x128xf32> to vector<1x8x128xf32>
      %cst_20 = arith.constant dense<0.000000e+00> : vector<1xf32>
      %32 = vector.multi_reduction <add>, %31, %cst_20 [1, 2] : vector<1x8x128xf32> to vector<1xf32>
      %33 = vector.shape_cast %32 : vector<1xf32> to vector<1x1x1xf32>
      %34 = vector.extract %33[0, 0, 0] : f32 from vector<1x1x1xf32>
      %cst_21 = arith.constant 1.000000e+00 : f32
      %35 = arith.addf %34, %cst_21 : f32
      %36 = arith.divf %29, %35 : f32
      %cst_22 = arith.constant 1.000000e+00 : f32
      %37 = arith.subf %cst_22, %36 : f32
      %38 = vector.broadcast %37 : f32 to vector<1x1x128xf32>
      %c0_23 = arith.constant 0 : index
      %c0_24 = arith.constant 0 : index
      %c0_25 = arith.constant 0 : index
      %39 = vector.load %arg4[%c0_23, %c0_24, %c0_25] : memref<1x1x128xf32, #tpu.memory_space<vmem>>, vector<1x1x128xf32>
      tpu.vector_store %arg4[%c0_23, %c0_24, %c0_25], %38 {strides = array<i32>} : memref<1x1x128xf32, #tpu.memory_space<vmem>>, vector<1x1x128xf32>,
    } else {
    }
    return
  }
  func.func @transform_0(%arg0: i32, %arg1: i32) -> (i32, i32, i32) {
    %c0_i32 = arith.constant 0 : i32
    %c0_i32_0 = arith.constant 0 : i32
    return %arg0, %arg1, %c0_i32 : i32, i32, i32
  }
  func.func @transform_1(%arg0: i32, %arg1: i32) -> (i32, i32, i32) {
    %c0_i32 = arith.constant 0 : i32
    %c0_i32_0 = arith.constant 0 : i32
    return %arg0, %arg1, %c0_i32 : i32, i32, i32
  }
  func.func @transform_2(%arg0: i32, %arg1: i32) -> (i32, i32, i32) {
    %c0_i32 = arith.constant 0 : i32
    %c0_i32_0 = arith.constant 0 : i32
    %c0_i32_1 = arith.constant 0 : i32
    return %arg0, %c0_i32, %c0_i32_0 : i32, i32, i32
  }
}

</mosaic_0001>

<bundles_post_ra>
// kernel: tpu_custom_call.1
= control target key start
LH: loop header
LB: loop body
LE: loop exit
PB: predicated region body
PF: predicated region fallthrough
CT: control target
= control target key end

     0   :  { %7 = vsyncpa [#allocation5], 0  ;;  %s851_s0 = inlined_call_operand.hbm [shape: f32[2,8,128], index: 0, kind: input, shape index: {}]   ;;  %s852_s1 = inlined_call_operand.hbm [shape: f32[2,8,128], index: 1, kind: input, shape index: {}]   ;;  %s853_s2 = inlined_call_operand.hbm [shape: f32[2,1,128], index: 2, kind: output, shape index: {}]  }
   0x1   :  { %9 = vsyncpa [#allocation5 + $0x1], 0 }
   0x2   :  { %10 = vsyncpa [#allocation8], 0 }
   0x3   :  { %12 = vsyncpa [#allocation8 + $0x1], 0 }
   0x4   :  { %13 = vsyncpa [#allocation6], 0 }
   0x5   :  { %15 = vsyncpa [#allocation6 + $0x1], 0  ;;  %s630_s9 = smov 0   ;;  %s632_s10 = smov 0  }
   0x6   :  { %s634_s11 = smov 0   ;;  %s636_s12 = smov 0  }
   0x7   :  { %s638_s13 = smov 0   ;;  %s640_s14 = smov 0  }
   0x8 LB: > { %s375_s15 = sadd.s32 4294967295, %s610_s14   ;;  %s376_s16 = sadd.s32 4294967294, %s610_s14   ;;  %s610_s14 = sphi %s640_s14, %s21_s14   ;;  %s606_s13 = sphi %s638_s13, %s873_s13   ;;  %s602_s12 = sphi %s636_s12, %s872_s12   ;;  %s598_s11 = sphi %s634_s11, %s871_s11   ;;  %s594_s10 = sphi %s632_s10, %s870_s10   ;;  %s590_s9 = sphi %s630_s9, %s869_s9  }
   0x9   : > { %s33_s17 = sadd.s32 1, %s606_s13  ;;  %s42_s18 = sadd.s32 1, %s598_s11 }
   0xa   : > { %p35_p0 = scmp.ge.s32.totalorder %s33_s17, 2  ;;  %p49_p1 = scmp.ne.s32.totalorder %s598_s11, %s594_s10 }
   0xb   : > { %p50_p2 = scmp.eq.s32.totalorder %s610_s14, 0  ;;  %p55_p3 = scmp.ne.s32.totalorder %s594_s10, %s590_s9 }
   0xc   : > { %s875_s17 = smov (%p35_p0, %s33_s17), 0  ;;  %p56_p5 = scmp.eq.s32.totalorder %s375_s15, 0 }
   0xd   : > { %p671_p4 = por %p50_p2, %p49_p1  ;;  %s37_s20 = ssub.s32 %s606_s13, %s875_s17 }
   0xe   : > { %p107_p6 = scmp.eq.s32.totalorder %s375_s15, 1  ;;  %p40_p7 = scmp.eq.s32.totalorder %s37_s20, 0 }
   0xf   : > { %p677_p8 = por %p56_p5, %p55_p3  ;;  %p113_p10 = scmp.eq.s32.totalorder %s376_s16, 1 }
  0x10   : > { %p681_p9 = por %p107_p6, %p49_p1  ;;  %p412_p13 = scmp.lt.s32.totalorder %s610_s14, 2 }
  0x11   : > { %s857_s21 = scalar_select %p677_p8, 1, 0 }
  0x12   : > { %s858_s22 = scalar_select %p681_p9, 1, 0 }
  0x13   : > { %s686_s23 = scalar_select %p40_p7, %s598_s11, %s42_s18  }
  0x14   : > { %p688_p11 = por %p113_p10, %p55_p3  ;;  %s695_s25 = sand.u32 1, %s598_s11  }
  0x15   : > { %s379_s26 = sshll.u32 %s695_s25, 3  ;;  %s380_s27 = sshll.u32 %s606_s13, 7 }
  0x16   : > { %s859_s24 = scalar_select %p688_p11, 1, 0 }
  0x17   : > { %s704_s30 = scalar_lea.hbm %s851_s0, %s380_s27  ;;  %s137_s3 = scalar_lea.vmem [#allocation4], %s379_s26 }
  0x18   : > { %s145_s4 = sshll.u32 %s137_s3, 4  ;;  %p712_p0 = pnand %p412_p13, %p671_p4  ;;  %s708_s4 = int_to_ptr.vmem [resolvable:$true] %s145_s4 }
  0x19   : > { %s134_s6 = scalar_lea.sflag [#allocation5], %s695_s25  ;;  %s464_s7 = scalar_lea.hbm %s704_s30, 128 }
  0x1a   : > { %p465_p3 = scmp.ne.s32.totalorder %s704_s30, %s464_s7  ;;  %p466_p5 = pneg %p712_p0 }
  0x1b   : > { %s469_s16 = scalar_lea.hbm %s851_s0, 256  ;;  %p470_p4 = scmp.lt.u32.totalorder %s704_s30, %s851_s0 }
  0x1c   : > { %p467_p6 = pnand %p466_p5, %p465_p3  ;;  %p471_p10 = scmp.lt.u32.totalorder %s469_s16, %s464_s7 }
  0x1d   : > { %p473_p12 = scmp.lt.u32.totalorder %s464_s7, %s704_s30 }
  0x1e   : > { %p468_p7 = pneg %p467_p6  ;;  %p472_p13 = por %p471_p10, %p470_p4 }
  0x20   : > { %p474_p1 = por %p473_p12, %p472_p13 }
  0x22   : > { %p475_p2 = pnand %p474_p1, %p468_p7 }
  0x24   : > { %478 = shalt.err (!%p475_p2)
}
  0x25   : > { %s479_s20 = scalar_lea.vmem %s708_s4, 128  ;;  %s612_s28 = smov [#allocation4]  }
  0x26   : > { %p480_p3 = scmp.ne.s32.totalorder %s708_s4, %s479_s20  ;;  %s484_s29 = sshll.u32 %s612_s28, 4  ;;  %s485_s29 = int_to_ptr.vmem [resolvable:$false] %s484_s29 }
  0x27   : > { %s486_s3 = scalar_lea.vmem %s485_s29, 256  ;;  %p487_p9 = scmp.lt.s32.totalorder %s708_s4, %s485_s29 }
  0x28   : > { %p482_p6 = pnand %p480_p3, %p466_p5  ;;  %p488_p4 = scmp.lt.s32.totalorder %s486_s3, %s479_s20 }
  0x2a   : > { %p483_p11 = pneg %p482_p6  ;;  %p489_p10 = por %p488_p4, %p487_p9 }
  0x2c   : > { %p490_p12 = pnand %p489_p10, %p483_p11 }
  0x2e   : > { %493 = shalt.err (!%p490_p12)
}
  0x2f   : > { %404 = dma.hbm_to_vmem [thread:$0]  (!%p712_p0), %s704_s30, 128, %s708_s4, %s134_s6  }
  0x30   : > { %p861_p1 = scmp.lt.s32.totalorder %s610_s14, 3  ;;  %p862_p2 = scmp.ge.s32.totalorder %s610_s14, 1 }
  0x31   : > { %s757_s16 = scalar_lea.hbm %s852_s1, %s380_s27  ;;  %s156_s18 = scalar_lea.vmem [#allocation7], %s379_s26 }
  0x32   : > { %p748_p7 = pnand %p862_p2, %p861_p1  ;;  %s164_s19 = sshll.u32 %s156_s18, 4  ;;  %s165_s19 = int_to_ptr.vmem [resolvable:$true] %s164_s19 }
  0x33   : > { %s153_s30 = scalar_lea.sflag [#allocation8], %s695_s25  ;;  %s494_s4 = scalar_lea.hbm %s757_s16, 128 }
  0x34   : > { %s863_s7 = scalar_select %p748_p7, 1, 0 }
  0x35   : > { %p495_p9 = scmp.ne.s32.totalorder %s757_s16, %s494_s4  ;;  %s499_s27 = scalar_lea.hbm %s852_s1, 256 }
  0x36   : > { %p500_p3 = scmp.lt.u32.totalorder %s757_s16, %s852_s1  ;;  %p501_p6 = scmp.lt.u32.totalorder %s499_s27, %s494_s4 }
  0x37   : > { %p497_p11 = pnand %p495_p9, %p466_p5  ;;  %p503_p10 = scmp.lt.u32.totalorder %s494_s4, %s757_s16 }
  0x38   : > { %p502_p4 = por %p501_p6, %p500_p3 }
  0x39   : > { %p498_p13 = pneg %p497_p11 }
  0x3a   : > { %p504_p12 = por %p503_p10, %p502_p4 }
  0x3c   : > { %p505_p1 = pnand %p504_p12, %p498_p13 }
  0x3e   : > { %508 = shalt.err (!%p505_p1)
}
  0x3f   : > { %s509_s25 = scalar_lea.vmem %s165_s19, 128  ;;  %s613_s26 = smov [#allocation7]  }
  0x40   : > { %p510_p2 = scmp.ne.s32.totalorder %s165_s19, %s509_s25  ;;  %s514_s3 = sshll.u32 %s613_s26, 4  ;;  %s515_s3 = int_to_ptr.vmem [resolvable:$false] %s514_s3 }
  0x41   : > { %s516_s8 = scalar_lea.vmem %s515_s3, 256  ;;  %p517_p8 = scmp.lt.s32.totalorder %s165_s19, %s515_s3 }
  0x42   : > { %p512_p9 = pnand %p510_p2, %p466_p5  ;;  %p518_p7 = scmp.lt.s32.totalorder %s516_s8, %s509_s25 }
  0x44   : > { %p513_p11 = pneg %p512_p9  ;;  %p519_p3 = por %p518_p7, %p517_p8 }
  0x46   : > { %p520_p6 = pnand %p519_p3, %p513_p11 }
  0x48   : > { %523 = shalt.err (!%p520_p6)
}
  0x49   : > { %407 = dma.hbm_to_vmem [thread:$0]  (!%p712_p0), %s757_s16, 128, %s165_s19, %s153_s30  }
  0x4a   : > { %p864_p13 = scmp.ne.s32.totalorder %s863_s7, 0 }
  0x4b   : > { %s784_s15 = sand.u32 (!%p864_p13), 1, %s594_s10   ;;  %p865_p5 = scmp.ne.s32.totalorder (!%p864_p13), %s857_s21, 0 }
  0x4c   : > { %173 = sbr.rel (%p864_p13) target bundleno = 380 (0x17c), region = 28  ;;  %s384_s18 = sshll.u32 (!%p864_p13), %s784_s15, 3 }
  0x4d   : > { %s176_s4 = scalar_lea.sflag (!%p864_p13), [#allocation5], %s784_s15  ;;  %s179_s6 = scalar_lea.vmem (!%p864_p13), [#allocation4], %s384_s18 }
  0x53   : > { %577 = dma.done.wait (%p865_p5), %s176_s4, 128  }
  0x54   : > { %579 = vsyncadd (%p865_p5), %s176_s4, 4294967168  ;;  %s185_s5 = scalar_lea.sflag [#allocation8], %s784_s15  ;;  %s188_s16 = scalar_lea.vmem [#allocation7], %s384_s18 }
  0x55   : > { %581 = dma.done.wait (%p865_p5), %s185_s5, 128  }
  0x56   : > { %583 = vsyncadd (%p865_p5), %s185_s5, 4294967168  ;;  %v219_v0 = vld [vmem:[%s179_s6] sm:$0xff]  ;;  %v220_v1 = vld [vmem:[%s188_s16] sm:$0xff]  ;;  %s386_s27 = sshll.u32 %s602_s12, 4  ;;  %s212_s29 = scalar_lea.vmem [#allocation9], %s784_s15 }
  0x57   : > { %v221_v2 = vmul.f32 %v220_v1, %v219_v0  ;;  %v222_v3 = vmul.f32 %v219_v0, %v219_v0  ;;  %v223_v4 = vmul.f32 %v220_v1, %v220_v1  ;;  %s276_s25 = sshll.u32 %s212_s29, 4  ;;  %s802_s18 = scalar_lea.hbm %s853_s2, %s386_s27  ;;  %s804_s25 = int_to_ptr.vmem [resolvable:$true] %s276_s25 }
  0x58   : > { %s264_s4 = scalar_lea.sflag [#allocation6], %s784_s15  ;;  %s524_s6 = scalar_lea.vmem %s804_s25, 16 }
  0x59   : > { %235 = vadd.xlane.f32.xlu0 %v221_v2  ;;  %v224_v5 = vadd.f32 %v223_v4, %v222_v3  ;;  %p525_p8 = scmp.ne.s32.totalorder %s804_s25, %s524_s6  ;;  %p866_p0 = scmp.ne.s32.totalorder %s858_s22, 0 }
  0x5a   : > { %s614_s12 = smov [#allocation9]  }
  0x5b   : > { %p526_p7 = pnand %p525_p8, %p866_p0  ;;  %s528_s5 = sshll.u32 %s614_s12, 4  ;;  %s529_s5 = int_to_ptr.vmem [resolvable:$false] %s528_s5 }
  0x5c   : > { %s530_s16 = scalar_lea.vmem %s529_s5, 32  ;;  %p531_p10 = scmp.lt.s32.totalorder %s804_s25, %s529_s5 }
  0x5d   : > { %246 = vadd.xlane.f32.xlu0 %v224_v5  ;;  %p527_p4 = pneg %p526_p7  ;;  %p532_p12 = scmp.lt.s32.totalorder %s530_s16, %s524_s6 }
  0x5f   : > { %p533_p1 = por %p532_p12, %p531_p10 }
  0x61   : > { %p534_p2 = pnand %p533_p1, %p527_p4 }
  0xe6   : > { %v236_v6 = vpop.xlane.xlu0 %235 }
  0xe7   : > { %v237_v7 = vrot.slane %v236_v6, 4 }
  0xe9   : > { %v238_v8 = vadd.f32 %v237_v7, %v236_v6 }
  0xea   : > { %v247_v9 = vpop.xlane.xlu0 %246 }
  0xeb   : > { %v239_v10 = vrot.slane %v238_v8, 2  ;;  %v248_v11 = vrot.slane %v247_v9, 4 }
  0xed   : > { %v249_v12 = vadd.f32 %v248_v11, %v247_v9  ;;  %v240_v13 = vadd.f32 %v239_v10, %v238_v8 }
  0xef   : > { %v250_v14 = vrot.slane %v249_v12, 2  ;;  %v241_v15 = vrot.slane %v240_v13, 1 }
  0xf1   : > { %v251_v16 = vadd.f32 %v250_v14, %v249_v12  ;;  %v242_v17 = vadd.f32 %v241_v15, %v240_v13 }
  0xf3   : > { %389 = vpush %v242_v17  ;;  %v252_v18 = vrot.slane %v251_v16, 1 }
  0xf5   : > { %v253_v19 = vadd.f32 %v252_v18, %v251_v16 }
  0xf7   : > { %391 = vpush %v253_v19 }
 0x124   : > { %s390_s21 = spop %389 }
 0x125   : > { %s244_s30 = sadd.f32 1.0, %s390_s21 }
 0x128   : > { %s392_s7 = spop %391 }
 0x129   : > { %s255_s19 = sadd.f32 1.0, %s392_s7 }
 0x12b   : > { %v256_v20 = vstv %s255_s19 }
 0x12c   : > { %462 = vrcp.f32 %v256_v20 }
 0x136   : > { %v463_v21 = vpop.eup %462 }
 0x137   : > { %393 = vpush %v463_v21 }
 0x168   : > { %s394_s20 = spop %393 }
 0x169   : > { %s259_s28 = smul.f32 %s394_s20, %s244_s30 }
 0x16b   : > { %s260_s26 = ssub.f32 1.0, %s259_s28 }
 0x16d   : > { %v261_v22 = vstv %s260_s26 }
 0x16e   : > { %262 = vst [vmem:[%s212_s29] sm:$0x1] %v261_v22 }
 0x16f   : > { %537 = shalt.err (!%p534_p2)
}
 0x170   : > { %s538_s15 = scalar_lea.hbm %s802_s18, 16  ;;  %s542_s19 = scalar_lea.hbm %s853_s2, 32 }
 0x171   : > { %p539_p9 = scmp.ne.s32.totalorder %s802_s18, %s538_s15  ;;  %p543_p6 = scmp.lt.u32.totalorder %s802_s18, %s853_s2 }
 0x172   : > { %p544_p13 = scmp.lt.u32.totalorder %s542_s19, %s538_s15  ;;  %p546_p8 = scmp.lt.u32.totalorder %s538_s15, %s802_s18 }
 0x173   : > { %p540_p11 = pnand %p539_p9, %p866_p0 }
 0x174   : > { %p545_p5 = por %p544_p13, %p543_p6 }
 0x175   : > { %p541_p3 = pneg %p540_p11 }
 0x176   : > { %p547_p7 = por %p546_p8, %p545_p5 }
 0x178   : > { %p548_p4 = pnand %p547_p7, %p541_p3 }
 0x17a   : > { %551 = shalt.err (!%p548_p4)
}
 0x17b   : > { %399 = dma.vmem_to_hbm [thread:$0]  (%p866_p0), %s804_s25, 16, %s802_s18, %s264_s4  }
 0x17c PF: > { %s288_s27 = sand.u32 1, %s590_s9   ;;  %p867_p10 = scmp.ne.s32.totalorder %s859_s24, 0 }
 0x17d   : > { %p868_p12 = scmp.ge.s32.totalorder %s610_s14, 2  ;;  %s289_s28 = scalar_lea.sflag [#allocation6], %s288_s27 }
 0x17f   : > { %p409_p1 = pnand %p868_p12, %p867_p10 }
 0x181   : > { %585 = dma.done.wait (!%p409_p1), %s289_s28, 16  }
 0x182   : > { %587 = vsyncadd (!%p409_p1), %s289_s28, 4294967280  ;;  %s21_s14 = sadd.s32 1, %s610_s14   ;;  %s869_s9 = smov %s594_s10 }
 0x183   : > { %p18_p2 = scmp.ge.s32.totalorder %s21_s14, 4   ;;  %s870_s10 = smov %s598_s11 }
 0x184   : > { %s871_s11 = smov %s686_s23  ;;  %s872_s12 = smov %s606_s13 }
 0x185   : > { %s873_s13 = smov %s875_s17  ;;  %20 = sbr.rel (!%p18_p2) target bundleno = 8 (0x8), region = 94 }
 0x18c   :  { %293 = vsyncpa [#allocation5], 1 }
 0x18d   :  { %295 = vsyncpa [#allocation5 + $0x1], 1 }
 0x18e   :  { %296 = vsyncpa [#allocation8], 1 }
 0x18f   :  { %298 = vsyncpa [#allocation8 + $0x1], 1 }
 0x190   :  { %299 = vsyncpa [#allocation6], 1 }
 0x191   :  { %301 = vsyncpa [#allocation6 + $0x1], 1 }

</bundles_post_ra>
